<compile_context>
chip_gen: v5e
topology: v5e:2x2
jax: 0.10.0
libtpu: 0.0.40
codegen_flags: <defaults>
</compile_context>

<pallas_src>
import functools

import jax
import jax.numpy as jnp
from jax.experimental import pallas as pl
from jax.experimental.pallas import tpu as pltpu

_LANE = 128
_SUBLANE = 8


def _round_up(x, m):
    return ((x + m - 1) // m) * m


def _gelu(x, approx):
    if approx:
        # tanh-approx GELU: tanh runs on the EUP slot instead of the long
        # erf polynomial on the (saturating) VALU slots.
        c = jnp.float32(0.7978845608028654)  # sqrt(2/pi)
        return 0.5 * x * (1.0 + jnp.tanh(c * (x + 0.044715 * x * x * x)))
    # PyTorch nn.GELU() default is the exact (erf-based) GELU.
    return 0.5 * x * (1.0 + jax.lax.erf(x * jnp.float32(0.7071067811865476)))


def prior_net_kernel(y_ref, w1_ref, b1_ref, lnw_ref, lnb_ref,
                     w2_ref, b2_ref, w3_ref, b3_ref,
                     whead_ref, bhead_ref,
                     out_ref, *, hidden_dim, latent_dim, approx_gelu):
    cd = w1_ref.dtype                      # matmul compute dtype (bf16 or f32)
    y = y_ref[...]

    # --- Linear 1 (weight-normed; effective W built in wrapper) + GELU ---
    h = jnp.dot(y.astype(cd), w1_ref[...],
                preferred_element_type=jnp.float32) + b1_ref[...]
    h = _gelu(h, approx_gelu)
    # Dropout(0.2): identity at inference (eval mode).

    # --- LayerNorm over the *real* hidden features only ---
    # Pad lanes of h are exactly zero (zero-padded weights/biases, GELU(0)=0),
    # so plain sums over the padded lane axis equal sums over the real lanes;
    # divide by the true feature count and mask the centered values.
    h_padded = h.shape[-1]
    inv_n = jnp.float32(1.0 / hidden_dim)
    feat_mask = jax.lax.broadcasted_iota(jnp.int32, (1, h_padded), 1) < hidden_dim
    mean = jnp.sum(h, axis=-1, keepdims=True) * inv_n
    centered = jnp.where(feat_mask, h - mean, 0.0)
    var = jnp.sum(centered * centered, axis=-1, keepdims=True) * inv_n
    h = centered * jax.lax.rsqrt(var + 1e-5)
    h = h * lnw_ref[...] + lnb_ref[...]    # ln_w / ln_b zero-padded -> pad lanes stay 0

    # --- Linear 2 + GELU ---
    h = jnp.dot(h.astype(cd), w2_ref[...],
                preferred_element_type=jnp.float32) + b2_ref[...]
    h = _gelu(h, approx_gelu)
    # Dropout(0.2): identity at inference.

    # --- Linear 3 (weight-normed) + GELU ---
    h = jnp.dot(h.astype(cd), w3_ref[...],
                preferred_element_type=jnp.float32) + b3_ref[...]
    h = _gelu(h, approx_gelu)

    # --- Fused mu|logvar heads: one lane-dense matmul, one lane-dense store ---
    head = jnp.dot(h.astype(cd), whead_ref[...],
                   preferred_element_type=jnp.float32) + bhead_ref[...]

    # Numerically stable softplus (threshold=20; identical post-clamp result),
    # then clamp + log for the logvar lanes.
    sp = jnp.where(head > 20.0, head, jnp.log1p(jnp.exp(jnp.minimum(head, 20.0))))
    logvar = jnp.log(jnp.clip(sp, 1e-4, 5.0))

    lane = jax.lax.broadcasted_iota(jnp.int32, head.shape, 1)
    is_lv = (lane >= latent_dim) & (lane < 2 * latent_dim)
    # lanes [0:latent) = mu, lanes [latent:2*latent) = logvar, rest = padding.
    out_ref[...] = jnp.where(is_lv, logvar, head)


def _weight_norm_effective(v, g):
    # PyTorch weight_norm with default dim=0: per output row, W = g * v / ||v||.
    norm = jnp.sqrt(jnp.sum(v * v, axis=1, keepdims=True))
    return g[:, None] * v / norm


def init_params(key, y_dim, latent_dim, hidden_dim):
    """Canonical (PyTorch-layout, unpadded) parameters."""
    ks = jax.random.split(key, 5)

    def lin(k, out_f, in_f):
        bound = 1.0 / jnp.sqrt(in_f)
        kw, kb = jax.random.split(k)
        w = jax.random.uniform(kw, (out_f, in_f), jnp.float32, -bound, bound)
        b = jax.random.uniform(kb, (out_f,), jnp.float32, -bound, bound)
        return w, b

    # Layer 1 (weight-normed): store v and g, build effective W.
    v1, b1 = lin(ks[0], hidden_dim, y_dim)
    g1 = jnp.sqrt(jnp.sum(v1 * v1, axis=1))          # PyTorch init: g = ||v||
    w1_eff = _weight_norm_effective(v1, g1)

    ln_w = jnp.ones((hidden_dim,), jnp.float32)
    ln_b = jnp.zeros((hidden_dim,), jnp.float32)

    w2, b2 = lin(ks[1], hidden_dim, hidden_dim)

    v3, b3 = lin(ks[2], hidden_dim, hidden_dim)
    g3 = jnp.sqrt(jnp.sum(v3 * v3, axis=1))
    w3_eff = _weight_norm_effective(v3, g3)

    wmu, bmu = lin(ks[3], latent_dim, hidden_dim)
    wlv, _ = lin(ks[4], latent_dim, hidden_dim)
    blv = jnp.full((latent_dim,), -3.0, jnp.float32)  # nn.init.constant_(bias, -3.0)

    return dict(w1_eff=w1_eff, b1=b1, ln_w=ln_w, ln_b=ln_b, w2=w2, b2=b2,
                w3_eff=w3_eff, b3=b3, wmu=wmu, bmu=bmu, wlv=wlv, blv=blv)


def _pad_to(a, shape):
    pads = [(0, s - d) for d, s in zip(a.shape, shape)]
    return jnp.pad(a, pads)


def prepare_kernel_params(p, y_dim, hidden_dim, latent_dim,
                          compute_dtype=jnp.bfloat16):
    """Transpose to [in, out], zero-pad output lanes to 128, fuse mu|lv heads.

    Pure parameter preprocessing: call ONCE per parameter set and reuse the
    result across forward calls (do not rebuild per call).
    """
    h_pad = _round_up(hidden_dim, _LANE)
    out_pad = _round_up(2 * latent_dim, _LANE)

    # y stays unpadded ([B, y_dim]); only output-lane axes are padded to 128.
    w1 = _pad_to(p["w1_eff"].T, (y_dim, h_pad)).astype(compute_dtype)
    b1 = _pad_to(p["b1"][None, :], (1, h_pad))
    lnw = _pad_to(p["ln_w"][None, :], (1, h_pad))
    lnb = _pad_to(p["ln_b"][None, :], (1, h_pad))
    w2 = _pad_to(p["w2"].T, (h_pad, h_pad)).astype(compute_dtype)
    b2 = _pad_to(p["b2"][None, :], (1, h_pad))
    w3 = _pad_to(p["w3_eff"].T, (h_pad, h_pad)).astype(compute_dtype)
    b3 = _pad_to(p["b3"][None, :], (1, h_pad))

    # Fused mu|logvar head, lane-padded to a dense 128-wide output slab.
    w_head = jnp.zeros((h_pad, out_pad), jnp.float32)
    w_head = w_head.at[:hidden_dim, :latent_dim].set(p["wmu"].T)
    w_head = w_head.at[:hidden_dim, latent_dim:2 * latent_dim].set(p["wlv"].T)
    w_head = w_head.astype(compute_dtype)
    b_head = jnp.zeros((1, out_pad), jnp.float32)
    b_head = b_head.at[0, :latent_dim].set(p["bmu"])
    b_head = b_head.at[0, latent_dim:2 * latent_dim].set(p["blv"])

    return (w1, b1, lnw, lnb, w2, b2, w3, b3, w_head, b_head)


def prior_net_forward(y, kernel_params, *, hidden_dim, latent_dim,
                      block_batch=2048, approx_gelu=False):
    B, y_dim = y.shape
    out_pad = _round_up(2 * latent_dim, _LANE)

    # Batch tile: as large as block_batch allows (per-grid-step overhead is
    # ~0.35us), but guarantee >= 2 grid steps whenever the batch allows so the
    # "parallel" axis actually shards across v7x's two TensorCores.
    b_pad0 = _round_up(B, _SUBLANE)
    half = _round_up((b_pad0 + 1) // 2, _SUBLANE)
    tb = max(_SUBLANE, min(block_batch, half))
    b_pad = _round_up(B, tb)

    # Batch-only padding; no feature-lane padding of y (block last dim = y_dim).
    y_p = jnp.pad(y.astype(jnp.float32), ((0, b_pad - B), (0, 0)))

    # Weights/biases: constant index_map -> resident in VMEM across grid steps.
    weight_specs = [pl.BlockSpec(k.shape, lambda i: (0, 0)) for k in kernel_params]

    kernel = functools.partial(prior_net_kernel,
                               hidden_dim=hidden_dim, latent_dim=latent_dim,
                               approx_gelu=approx_gelu)

    out = pl.pallas_call(
        kernel,
        grid=(b_pad // tb,),
        in_specs=[pl.BlockSpec((tb, y_dim), lambda i: (i, 0))] + weight_specs,
        out_specs=pl.BlockSpec((tb, out_pad), lambda i: (i, 0)),
        out_shape=jax.ShapeDtypeStruct((b_pad, out_pad), jnp.float32),
        compiler_params=pltpu.CompilerParams(
            dimension_semantics=("parallel",)),
    )(y_p, *kernel_params)

    mu = out[:B, :latent_dim]
    logvar = out[:B, latent_dim:2 * latent_dim]
    return mu, logvar


def prior_net_reference(y, p):
    # Pure-JAX reference mirroring the PyTorch forward (eval mode).
    def gelu(x):
        return 0.5 * x * (1.0 + jax.lax.erf(x * 0.7071067811865476))

    h = gelu(y @ p["w1_eff"].T + p["b1"])
    mean = jnp.mean(h, axis=-1, keepdims=True)
    var = jnp.mean((h - mean) ** 2, axis=-1, keepdims=True)
    h = (h - mean) / jnp.sqrt(var + 1e-5) * p["ln_w"] + p["ln_b"]
    h = gelu(h @ p["w2"].T + p["b2"])
    h = gelu(h @ p["w3_eff"].T + p["b3"])
    mu = h @ p["wmu"].T + p["bmu"]
    lv = h @ p["wlv"].T + p["blv"]
    lv = jnp.clip(jnp.log1p(jnp.exp(lv)), 1e-4, 5.0)
    return mu, jnp.log(lv)


if __name__ == "__main__":
    B, Y_DIM, LATENT_DIM, HIDDEN_DIM = 4, 16, 8, 32

    key = jax.random.PRNGKey(0)
    k_param, k_y = jax.random.split(key)

    params = init_params(k_param, Y_DIM, LATENT_DIM, HIDDEN_DIM)
    y = jax.random.normal(k_y, (B, Y_DIM), jnp.float32)

    mu_ref, logvar_ref = prior_net_reference(y, params)

    # --- f32 parity path (exact PyTorch eval-mode semantics) ---
    kp_f32 = prepare_kernel_params(params, Y_DIM, HIDDEN_DIM, LATENT_DIM,
                                   compute_dtype=jnp.float32)
    mu, logvar = prior_net_forward(y, kp_f32,
                                   hidden_dim=HIDDEN_DIM, latent_dim=LATENT_DIM)
    jax.block_until_ready((mu, logvar))
    assert mu.shape == (B, LATENT_DIM) and logvar.shape == (B, LATENT_DIM)
    assert jnp.allclose(mu, mu_ref, atol=1e-4, rtol=1e-4)
    assert jnp.allclose(logvar, logvar_ref, atol=1e-4, rtol=1e-4)

    # --- bf16 fast path (default prepare dtype): bf16 MXU rate, half the
    #     resident-weight VMEM / weight DMA; checked to a relaxed tolerance ---
    kp_bf16 = prepare_kernel_params(params, Y_DIM, HIDDEN_DIM, LATENT_DIM)
    mu_b, logvar_b = prior_net_forward(y, kp_bf16,
                                       hidden_dim=HIDDEN_DIM, latent_dim=LATENT_DIM)
    jax.block_until_ready((mu_b, logvar_b))
    assert jnp.allclose(mu_b, mu_ref, atol=1e-1)
    assert jnp.allclose(logvar_b, logvar_ref, atol=1e-1)

    print("KERNEL_OK")
</pallas_src>

<mosaic_0001>
module attributes {stable_mosaic.version = 11 : i64} {
  func.func @prior_net_kernel(%arg0: i32, %arg1: memref<8x16xf32, #tpu.memory_space<vmem>>, %arg2: memref<16x128xf32, #tpu.memory_space<vmem>>, %arg3: memref<1x128xf32, #tpu.memory_space<vmem>>, %arg4: memref<1x128xf32, #tpu.memory_space<vmem>>, %arg5: memref<1x128xf32, #tpu.memory_space<vmem>>, %arg6: memref<128x128xf32, #tpu.memory_space<vmem>>, %arg7: memref<1x128xf32, #tpu.memory_space<vmem>>, %arg8: memref<128x128xf32, #tpu.memory_space<vmem>>, %arg9: memref<1x128xf32, #tpu.memory_space<vmem>>, %arg10: memref<128x128xf32, #tpu.memory_space<vmem>>, %arg11: memref<1x128xf32, #tpu.memory_space<vmem>>, %arg12: memref<8x128xf32, #tpu.memory_space<vmem>>) attributes {dimension_semantics = [#tpu.dimension_semantics<parallel>], iteration_bounds = array<i64: 1>, scalar_prefetch = 0 : i64, scratch_operands = 0 : i64, tpu.core_type = #tpu.core_type<tc>, window_params = [{transform_indices = @transform_0, window_bounds = array<i64: 8, 16>}, {pipeline_mode = #tpu.pipeline_mode<synchronous>, transform_indices = @transform_1, window_bounds = array<i64: 16, 128>}, {pipeline_mode = #tpu.pipeline_mode<synchronous>, transform_indices = @transform_2, window_bounds = array<i64: 1, 128>}, {pipeline_mode = #tpu.pipeline_mode<synchronous>, transform_indices = @transform_3, window_bounds = array<i64: 1, 128>}, {pipeline_mode = #tpu.pipeline_mode<synchronous>, transform_indices = @transform_4, window_bounds = array<i64: 1, 128>}, {pipeline_mode = #tpu.pipeline_mode<synchronous>, transform_indices = @transform_5, window_bounds = array<i64: 128, 128>}, {pipeline_mode = #tpu.pipeline_mode<synchronous>, transform_indices = @transform_6, window_bounds = array<i64: 1, 128>}, {pipeline_mode = #tpu.pipeline_mode<synchronous>, transform_indices = @transform_7, window_bounds = array<i64: 128, 128>}, {pipeline_mode = #tpu.pipeline_mode<synchronous>, transform_indices = @transform_8, window_bounds = array<i64: 1, 128>}, {pipeline_mode = #tpu.pipeline_mode<synchronous>, transform_indices = @transform_9, window_bounds = array<i64: 128, 128>}, {pipeline_mode = #tpu.pipeline_mode<synchronous>, transform_indices = @transform_10, window_bounds = array<i64: 1, 128>}, {transform_indices = @transform_11, window_bounds = array<i64: 8, 128>}]} {
    %c0 = arith.constant 0 : index
    %c0_0 = arith.constant 0 : index
    %0 = vector.load %arg1[%c0, %c0_0] : memref<8x16xf32, #tpu.memory_space<vmem>>, vector<8x16xf32>
    %c0_1 = arith.constant 0 : index
    %c0_2 = arith.constant 0 : index
    %1 = vector.load %arg2[%c0_1, %c0_2] : memref<16x128xf32, #tpu.memory_space<vmem>>, vector<16x128xf32>
    %cst = arith.constant dense<0.000000e+00> : vector<8x128xf32>
    %2 = tpu.matmul %0, %1, %cst {dimension_numbers = #tpu.dot_dimension_numbers<[1], [0], [0], [1], [0, 0, 1, 1], [], []>} : vector<8x16xf32>, vector<16x128xf32>, vector<8x128xf32> -> vector<8x128xf32>
    %c0_3 = arith.constant 0 : index
    %c0_4 = arith.constant 0 : index
    %3 = vector.load %arg3[%c0_3, %c0_4] : memref<1x128xf32, #tpu.memory_space<vmem>>, vector<1x128xf32>
    %4 = vector.broadcast %3 : vector<1x128xf32> to vector<8x128xf32>
    %5 = arith.addf %2, %4 : vector<8x128xf32>
    %cst_5 = arith.constant 5.000000e-01 : f32
    %6 = vector.broadcast %cst_5 : f32 to vector<8x128xf32>
    %7 = arith.mulf %6, %5 : vector<8x128xf32>
    %cst_6 = arith.constant 0.707106769 : f32
    %8 = vector.broadcast %cst_6 : f32 to vector<8x128xf32>
    %9 = arith.mulf %5, %8 : vector<8x128xf32>
    %10 = math.erf %9 : vector<8x128xf32>
    %cst_7 = arith.constant 1.000000e+00 : f32
    %11 = vector.broadcast %cst_7 : f32 to vector<8x128xf32>
    %12 = arith.addf %11, %10 : vector<8x128xf32>
    %13 = arith.mulf %7, %12 : vector<8x128xf32>
    %14 = tpu.iota {dimensions = array<i32: 1>} : vector<1x128xi32>
    %c32_i32 = arith.constant 32 : i32
    %15 = vector.broadcast %c32_i32 : i32 to vector<1x128xi32>
    %16 = arith.cmpi slt, %14, %15 : vector<1x128xi32>
    %cst_8 = arith.constant dense<0.000000e+00> : vector<8xf32>
    %17 = vector.multi_reduction <add>, %13, %cst_8 [1] : vector<8x128xf32> to vector<8xf32>
    %18 = vector.shape_cast %17 : vector<8xf32> to vector<8x1xf32>
    %cst_9 = arith.constant 3.125000e-02 : f32
    %19 = vector.broadcast %cst_9 : f32 to vector<8x1xf32>
    %20 = arith.mulf %18, %19 : vector<8x1xf32>
    %21 = vector.broadcast %20 : vector<8x1xf32> to vector<8x128xf32>
    %22 = arith.subf %13, %21 : vector<8x128xf32>
    %cst_10 = arith.constant 0.000000e+00 : f32
    %23 = vector.shape_cast %16 : vector<1x128xi1> to vector<1x128xi1>
    %24 = vector.broadcast %23 : vector<1x128xi1> to vector<8x128xi1>
    %25 = vector.broadcast %cst_10 : f32 to vector<8x128xf32>
    %26 = arith.select %24, %22, %25 : vector<8x128xi1>, vector<8x128xf32>
    %27 = arith.mulf %26, %26 : vector<8x128xf32>
    %cst_11 = arith.constant dense<0.000000e+00> : vector<8xf32>
    %28 = vector.multi_reduction <add>, %27, %cst_11 [1] : vector<8x128xf32> to vector<8xf32>
    %29 = vector.shape_cast %28 : vector<8xf32> to vector<8x1xf32>
    %cst_12 = arith.constant 3.125000e-02 : f32
    %30 = vector.broadcast %cst_12 : f32 to vector<8x1xf32>
    %31 = arith.mulf %29, %30 : vector<8x1xf32>
    %cst_13 = arith.constant 9.99999974E-6 : f32
    %32 = vector.broadcast %cst_13 : f32 to vector<8x1xf32>
    %33 = arith.addf %31, %32 : vector<8x1xf32>
    %34 = math.rsqrt %33 : vector<8x1xf32>
    %35 = vector.broadcast %34 : vector<8x1xf32> to vector<8x128xf32>
    %36 = arith.mulf %26, %35 : vector<8x128xf32>
    %c0_14 = arith.constant 0 : index
    %c0_15 = arith.constant 0 : index
    %37 = vector.load %arg4[%c0_14, %c0_15] : memref<1x128xf32, #tpu.memory_space<vmem>>, vector<1x128xf32>
    %38 = vector.broadcast %37 : vector<1x128xf32> to vector<8x128xf32>
    %39 = arith.mulf %36, %38 : vector<8x128xf32>
    %c0_16 = arith.constant 0 : index
    %c0_17 = arith.constant 0 : index
    %40 = vector.load %arg5[%c0_16, %c0_17] : memref<1x128xf32, #tpu.memory_space<vmem>>, vector<1x128xf32>
    %41 = vector.broadcast %40 : vector<1x128xf32> to vector<8x128xf32>
    %42 = arith.addf %39, %41 : vector<8x128xf32>
    %c0_18 = arith.constant 0 : index
    %c0_19 = arith.constant 0 : index
    %43 = vector.load %arg6[%c0_18, %c0_19] : memref<128x128xf32, #tpu.memory_space<vmem>>, vector<128x128xf32>
    %cst_20 = arith.constant dense<0.000000e+00> : vector<8x128xf32>
    %44 = tpu.matmul %42, %43, %cst_20 {dimension_numbers = #tpu.dot_dimension_numbers<[1], [0], [0], [1], [0, 0, 1, 1], [], []>} : vector<8x128xf32>, vector<128x128xf32>, vector<8x128xf32> -> vector<8x128xf32>
    %c0_21 = arith.constant 0 : index
    %c0_22 = arith.constant 0 : index
    %45 = vector.load %arg7[%c0_21, %c0_22] : memref<1x128xf32, #tpu.memory_space<vmem>>, vector<1x128xf32>
    %46 = vector.broadcast %45 : vector<1x128xf32> to vector<8x128xf32>
    %47 = arith.addf %44, %46 : vector<8x128xf32>
    %cst_23 = arith.constant 5.000000e-01 : f32
    %48 = vector.broadcast %cst_23 : f32 to vector<8x128xf32>
    %49 = arith.mulf %48, %47 : vector<8x128xf32>
    %cst_24 = arith.constant 0.707106769 : f32
    %50 = vector.broadcast %cst_24 : f32 to vector<8x128xf32>
    %51 = arith.mulf %47, %50 : vector<8x128xf32>
    %52 = math.erf %51 : vector<8x128xf32>
    %cst_25 = arith.constant 1.000000e+00 : f32
    %53 = vector.broadcast %cst_25 : f32 to vector<8x128xf32>
    %54 = arith.addf %53, %52 : vector<8x128xf32>
    %55 = arith.mulf %49, %54 : vector<8x128xf32>
    %c0_26 = arith.constant 0 : index
    %c0_27 = arith.constant 0 : index
    %56 = vector.load %arg8[%c0_26, %c0_27] : memref<128x128xf32, #tpu.memory_space<vmem>>, vector<128x128xf32>
    %cst_28 = arith.constant dense<0.000000e+00> : vector<8x128xf32>
    %57 = tpu.matmul %55, %56, %cst_28 {dimension_numbers = #tpu.dot_dimension_numbers<[1], [0], [0], [1], [0, 0, 1, 1], [], []>} : vector<8x128xf32>, vector<128x128xf32>, vector<8x128xf32> -> vector<8x128xf32>
    %c0_29 = arith.constant 0 : index
    %c0_30 = arith.constant 0 : index
    %58 = vector.load %arg9[%c0_29, %c0_30] : memref<1x128xf32, #tpu.memory_space<vmem>>, vector<1x128xf32>
    %59 = vector.broadcast %58 : vector<1x128xf32> to vector<8x128xf32>
    %60 = arith.addf %57, %59 : vector<8x128xf32>
    %cst_31 = arith.constant 5.000000e-01 : f32
    %61 = vector.broadcast %cst_31 : f32 to vector<8x128xf32>
    %62 = arith.mulf %61, %60 : vector<8x128xf32>
    %cst_32 = arith.constant 0.707106769 : f32
    %63 = vector.broadcast %cst_32 : f32 to vector<8x128xf32>
    %64 = arith.mulf %60, %63 : vector<8x128xf32>
    %65 = math.erf %64 : vector<8x128xf32>
    %cst_33 = arith.constant 1.000000e+00 : f32
    %66 = vector.broadcast %cst_33 : f32 to vector<8x128xf32>
    %67 = arith.addf %66, %65 : vector<8x128xf32>
    %68 = arith.mulf %62, %67 : vector<8x128xf32>
    %c0_34 = arith.constant 0 : index
    %c0_35 = arith.constant 0 : index
    %69 = vector.load %arg10[%c0_34, %c0_35] : memref<128x128xf32, #tpu.memory_space<vmem>>, vector<128x128xf32>
    %cst_36 = arith.constant dense<0.000000e+00> : vector<8x128xf32>
    %70 = tpu.matmul %68, %69, %cst_36 {dimension_numbers = #tpu.dot_dimension_numbers<[1], [0], [0], [1], [0, 0, 1, 1], [], []>} : vector<8x128xf32>, vector<128x128xf32>, vector<8x128xf32> -> vector<8x128xf32>
    %c0_37 = arith.constant 0 : index
    %c0_38 = arith.constant 0 : index
    %71 = vector.load %arg11[%c0_37, %c0_38] : memref<1x128xf32, #tpu.memory_space<vmem>>, vector<1x128xf32>
    %72 = vector.broadcast %71 : vector<1x128xf32> to vector<8x128xf32>
    %73 = arith.addf %70, %72 : vector<8x128xf32>
    %cst_39 = arith.constant 2.000000e+01 : f32
    %74 = vector.broadcast %cst_39 : f32 to vector<8x128xf32>
    %75 = arith.cmpf ogt, %73, %74 : vector<8x128xf32>
    %cst_40 = arith.constant 2.000000e+01 : f32
    %76 = vector.broadcast %cst_40 : f32 to vector<8x128xf32>
    %77 = arith.minimumf %73, %76 : vector<8x128xf32>
    %78 = math.exp %77 : vector<8x128xf32>
    %79 = math.log1p %78 : vector<8x128xf32>
    %80 = arith.select %75, %73, %79 : vector<8x128xi1>, vector<8x128xf32>
    %cst_41 = arith.constant 9.99999974E-5 : f32
    %cst_42 = arith.constant 5.000000e+00 : f32
    %81 = vector.broadcast %cst_41 : f32 to vector<8x128xf32>
    %82 = arith.maximumf %81, %80 : vector<8x128xf32>
    %83 = vector.broadcast %cst_42 : f32 to vector<8x128xf32>
    %84 = arith.minimumf %83, %82 : vector<8x128xf32>
    %85 = math.log %84 : vector<8x128xf32>
    %86 = tpu.iota {dimensions = array<i32: 1>} : vector<8x128xi32>
    %c8_i32 = arith.constant 8 : i32
    %87 = vector.broadcast %c8_i32 : i32 to vector<8x128xi32>
    %88 = arith.cmpi sge, %86, %87 : vector<8x128xi32>
    %c16_i32 = arith.constant 16 : i32
    %89 = vector.broadcast %c16_i32 : i32 to vector<8x128xi32>
    %90 = arith.cmpi slt, %86, %89 : vector<8x128xi32>
    %91 = arith.andi %88, %90 : vector<8x128xi1>
    %92 = arith.select %91, %85, %73 : vector<8x128xi1>, vector<8x128xf32>
    %c0_43 = arith.constant 0 : index
    %c0_44 = arith.constant 0 : index
    %93 = vector.load %arg12[%c0_43, %c0_44] : memref<8x128xf32, #tpu.memory_space<vmem>>, vector<8x128xf32>
    tpu.vector_store %arg12[%c0_43, %c0_44], %92 {strides = array<i32>} : memref<8x128xf32, #tpu.memory_space<vmem>>, vector<8x128xf32>,
    return
  }
  func.func @transform_0(%arg0: i32) -> (i32, i32) {
    %c0_i32 = arith.constant 0 : i32
    %c0_i32_0 = arith.constant 0 : i32
    return %arg0, %c0_i32 : i32, i32
  }
  func.func @transform_1(%arg0: i32) -> (i32, i32) {
    %c0_i32 = arith.constant 0 : i32
    %c0_i32_0 = arith.constant 0 : i32
    %c0_i32_1 = arith.constant 0 : i32
    return %c0_i32, %c0_i32_0 : i32, i32
  }
  func.func @transform_2(%arg0: i32) -> (i32, i32) {
    %c0_i32 = arith.constant 0 : i32
    %c0_i32_0 = arith.constant 0 : i32
    %c0_i32_1 = arith.constant 0 : i32
    return %c0_i32, %c0_i32_0 : i32, i32
  }
  func.func @transform_3(%arg0: i32) -> (i32, i32) {
    %c0_i32 = arith.constant 0 : i32
    %c0_i32_0 = arith.constant 0 : i32
    %c0_i32_1 = arith.constant 0 : i32
    return %c0_i32, %c0_i32_0 : i32, i32
  }
  func.func @transform_4(%arg0: i32) -> (i32, i32) {
    %c0_i32 = arith.constant 0 : i32
    %c0_i32_0 = arith.constant 0 : i32
    %c0_i32_1 = arith.constant 0 : i32
    return %c0_i32, %c0_i32_0 : i32, i32
  }
  func.func @transform_5(%arg0: i32) -> (i32, i32) {
    %c0_i32 = arith.constant 0 : i32
    %c0_i32_0 = arith.constant 0 : i32
    %c0_i32_1 = arith.constant 0 : i32
    return %c0_i32, %c0_i32_0 : i32, i32
  }
  func.func @transform_6(%arg0: i32) -> (i32, i32) {
    %c0_i32 = arith.constant 0 : i32
    %c0_i32_0 = arith.constant 0 : i32
    %c0_i32_1 = arith.constant 0 : i32
    return %c0_i32, %c0_i32_0 : i32, i32
  }
  func.func @transform_7(%arg0: i32) -> (i32, i32) {
    %c0_i32 = arith.constant 0 : i32
    %c0_i32_0 = arith.constant 0 : i32
    %c0_i32_1 = arith.constant 0 : i32
    return %c0_i32, %c0_i32_0 : i32, i32
  }
  func.func @transform_8(%arg0: i32) -> (i32, i32) {
    %c0_i32 = arith.constant 0 : i32
    %c0_i32_0 = arith.constant 0 : i32
    %c0_i32_1 = arith.constant 0 : i32
    return %c0_i32, %c0_i32_0 : i32, i32
  }
  func.func @transform_9(%arg0: i32) -> (i32, i32) {
    %c0_i32 = arith.constant 0 : i32
    %c0_i32_0 = arith.constant 0 : i32
    %c0_i32_1 = arith.constant 0 : i32
    return %c0_i32, %c0_i32_0 : i32, i32
  }
  func.func @transform_10(%arg0: i32) -> (i32, i32) {
    %c0_i32 = arith.constant 0 : i32
    %c0_i32_0 = arith.constant 0 : i32
    %c0_i32_1 = arith.constant 0 : i32
    return %c0_i32, %c0_i32_0 : i32, i32
  }
  func.func @transform_11(%arg0: i32) -> (i32, i32) {
    %c0_i32 = arith.constant 0 : i32
    %c0_i32_0 = arith.constant 0 : i32
    return %arg0, %c0_i32 : i32, i32
  }
}

</mosaic_0001>

<bundles_post_ra>
// kernel: tpu_custom_call.1
= control target key start
LH: loop header
LB: loop body
LE: loop exit
PB: predicated region body
PF: predicated region fallthrough
CT: control target
= control target key end

     0   :  { %16 = vsyncpa [#allocation3], 0  ;;  %s769_s0 = inlined_call_operand.hbm [shape: f32[8,16], index: 0, kind: input, shape index: {}]   ;;  %s770_s1 = inlined_call_operand.hbm [shape: f32[16,128], index: 1, kind: input, shape index: {}]   ;;  %s771_s2 = inlined_call_operand.vmem [shape: f32[1,128], index: 2, kind: input, shape index: {}]   ;;  %s772_s3 = inlined_call_operand.vmem [shape: f32[1,128], index: 3, kind: input, shape index: {}]   ;;  %s773_s4 = inlined_call_operand.vmem [shape: f32[1,128], index: 4, kind: input, shape index: {}]   ;;  %s774_s5 = inlined_call_operand.hbm [shape: f32[128,128], index: 5, kind: input, shape index: {}]   ;;  %s775_s6 = inlined_call_operand.vmem [shape: f32[1,128], index: 6, kind: input, shape index: {}]   ;;  %s776_s7 = inlined_call_operand.hbm [shape: f32[128,128], index: 7, kind: input, shape index: {}]   ;;  %s777_s8 = inlined_call_operand.vmem [shape: f32[1,128], index: 8, kind: input, shape index: {}]   ;;  %s778_s9 = inlined_call_operand.hbm [shape: f32[128,128], index: 9, kind: input, shape index: {}]   ;;  %s779_s10 = inlined_call_operand.vmem [shape: f32[1,128], index: 10, kind: input, shape index: {}]   ;;  %s780_s11 = inlined_call_operand.hbm [shape: f32[8,128], index: 11, kind: output, shape index: {}]  }
   0x1   :  { %17 = vsyncpa [#allocation6], 0 }
   0x2   :  { %18 = vsyncpa [#allocation9], 0  ;;  %s35_s19 = sshll.u32 %s770_s1, 4  ;;  %s36_s19 = int_to_ptr.hbm [resolvable:$true] %s35_s19 }
   0x3   :  { %19 = vsyncpa [#allocation4], 0  ;;  %s660_s20 = smov [#allocation5]   ;;  %s69_s24 = sshll.u32 %s776_s7, 4  ;;  %s70_s24 = int_to_ptr.hbm [resolvable:$true] %s69_s24 }
   0x4   :  { %s37_s21 = sshll.u32 %s660_s20, 4  ;;  %s661_s25 = smov 128   ;;  %s38_s21 = int_to_ptr.vmem [resolvable:$true] %s37_s21 }
   0x5   :  { %s662_s26 = smov 8   ;;  %s663_s27 = smov [#allocation8]  }
   0x6   :  { %43 = dma.hbm_to_vmem [thread:$0]  %s36_s19, 256, %s38_s21, [#allocation6], %s661_s25, %s661_s25, %s662_s26  }
   0x7   :  { %s71_s28 = sshll.u32 %s663_s27, 4  ;;  %s25_s12 = sshll.u32 %s769_s0, 4  ;;  %s72_s28 = int_to_ptr.vmem [resolvable:$true] %s71_s28  ;;  %s26_s12 = int_to_ptr.hbm [resolvable:$true] %s25_s12 }
   0x8   :  { %77 = dma.hbm_to_vmem [thread:$0]  %s70_s24, 2048, %s72_s28, [#allocation9], %s661_s25, %s661_s25, %s662_s26  }
   0x9   :  { %s54_s14 = sshll.u32 %s774_s5, 4  ;;  %s664_s15 = smov [#allocation2]   ;;  %s55_s14 = int_to_ptr.hbm [resolvable:$true] %s54_s14 }
   0xa   :  { %s27_s16 = sshll.u32 %s664_s15, 4  ;;  %s665_s7 = smov [#allocation7]   ;;  %s28_s16 = int_to_ptr.vmem [resolvable:$true] %s27_s16 }
   0xb   :  { %30 = dma.hbm_to_vmem [thread:$0]  %s26_s12, 128, %s28_s16, [#allocation3]  }
   0xc   :  { %s56_s17 = sshll.u32 %s665_s7, 4  ;;  %s84_s20 = sshll.u32 %s778_s9, 4  ;;  %s57_s17 = int_to_ptr.vmem [resolvable:$true] %s56_s17  ;;  %s85_s20 = int_to_ptr.hbm [resolvable:$true] %s84_s20 }
   0xd   :  { %62 = dma.hbm_to_vmem [thread:$0]  %s55_s14, 2048, %s57_s17, [#allocation6], %s661_s25, %s661_s25, %s662_s26  }
   0xe   :  { %s666_s0 = smov [#allocation10]  }
   0xf   :  { %s86_s21 = sshll.u32 %s666_s0, 4  ;;  %s87_s21 = int_to_ptr.vmem [resolvable:$true] %s86_s21 }
  0x10   :  { %92 = dma.hbm_to_vmem [thread:$0]  %s85_s20, 2048, %s87_s21, [#allocation9], %s661_s25, %s661_s25, %s662_s26  }
  0x11   :  { %652 = dma.done.wait [#allocation3], 128  }
  0x12   :  { %653 = vsyncadd [#allocation3], 4294967168 }
  0x13   :  { %654 = dma.done.wait [#allocation6], 2304  }
  0x14   :  { %655 = vsyncadd [#allocation6], 4294964992 }
  0x15   :  { %656 = dma.done.wait [#allocation9], 4096  }
  0x16   :  { %657 = vsyncadd [#allocation9], 4294963200  ;;  %v117_v0 = vld [vmem:[#allocation5 + $0x8] sm:$0xff]  ;;  %v116_v1 = vld [vmem:[#allocation5] sm:$0xff]  ;;  %vm122_vm0 = vcmask 130048   ;;  %v190_v47 = vlaneseq  ;;  %s464_s30 = sshll.u32 %s780_s11, 4  ;;  %s465_s30 = int_to_ptr.hbm [resolvable:$true] %s464_s30 }
  0x17   :  { %140 = vmatpush.msra.mxu0 %v117_v0  ;;  %v115_v2 = vld [vmem:[#allocation2] sm:$0xff]  ;;  %v241_v45 = vld [vmem:[#allocation7 + $0x78] sm:$0xff]  ;;  %v240_v46 = vld [vmem:[#allocation7 + $0x70] sm:$0xff] }
  0x18   :  { %v488_v3 = vld [vmem:[%s771_s2] ss:$0 sm:$0xff]  ;;  %246 = vmatpush.msra.mxu1 %v241_v45  ;;  %v746_v48 = vand.u32 127, %v190_v47  ;;  %v238_v55 = vld [vmem:[#allocation7 + $0x60] sm:$0xff]  ;;  %v237_v56 = vld [vmem:[#allocation7 + $0x58] sm:$0xff] }
  0x19   :  { %141 = vmatpush.msra.mxu0 %v116_v1  ;;  %v239_v54 = vld [vmem:[#allocation7 + $0x68] sm:$0xff]  ;;  %v236_v57 = vld [vmem:[#allocation7 + $0x50] sm:$0xff]  ;;  %v234_v59 = vld [vmem:[#allocation7 + $0x40] sm:$0xff] }
  0x1a   :  { %476 = vmatmul.msk.f32.vlgmr.msra.gmra.mxu0 %vm122_vm0, %v115_v2  ;;  %247 = vmatpush.msra.mxu1 %v240_v46  ;;  %vm192_vm5 = vcmp.lt.s32.totalorder %v746_v48, 32  ;;  %v235_v58 = vld [vmem:[#allocation7 + $0x48] sm:$0xff]  ;;  %v233_v60 = vld [vmem:[#allocation7 + $0x38] sm:$0xff]  ;;  %v232_v61 = vld [vmem:[#allocation7 + $0x30] sm:$0xff] }
  0x1b   :  { %v231_v62 = vld [vmem:[#allocation7 + $0x28] sm:$0xff]  ;;  %v230_v63 = vld [vmem:[#allocation7 + $0x20] sm:$0xff]  ;;  %v229_v0 = vld [vmem:[#allocation7 + $0x18] sm:$0xff] }
  0x1c   :  { %248 = vmatpush.msra.mxu1 %v239_v54  ;;  %v228_v1 = vld [vmem:[#allocation7 + $0x10] sm:$0xff]  ;;  %v227_v2 = vld [vmem:[#allocation7 + $0x8] sm:$0xff] }
  0x1d   :  { %v311_v47 = vld [vmem:[#allocation8 + $0x8] sm:$0xff] }
  0x1e   :  { %249 = vmatpush.msra.mxu1 %v238_v55 }
  0x20   :  { %250 = vmatpush.msra.mxu1 %v237_v56 }
  0x22   :  { %251 = vmatpush.msra.mxu1 %v236_v57 }
  0x24   :  { %252 = vmatpush.msra.mxu1 %v235_v58 }
  0x26   :  { %253 = vmatpush.msra.mxu1 %v234_v59 }
  0x28   :  { %254 = vmatpush.msra.mxu1 %v233_v60 }
  0x2a   :  { %255 = vmatpush.msra.mxu1 %v232_v61 }
  0x2c   :  { %256 = vmatpush.msra.mxu1 %v231_v62 }
  0x2e   :  { %257 = vmatpush.msra.mxu1 %v230_v63 }
  0x30   :  { %258 = vmatpush.msra.mxu1 %v229_v0 }
  0x32   :  { %259 = vmatpush.msra.mxu1 %v228_v1 }
  0x34   :  { %260 = vmatpush.msra.mxu1 %v227_v2 }
  0x97   :  { %v143_v4 = vpop.f32.mrf.mxu0 }
  0x98   :  { %v144_v5 = vadd.f32 %v488_v3, %v143_v4  ;;  %v226_v3 = vld [vmem:[#allocation7] sm:$0xff] }
  0x99   :  { %261 = vmatpush.msra.mxu1 %v226_v3 }
  0x9a   :  { %v147_v6 = vmul.f32 0.70710677, %v144_v5  ;;  %v146_v42 = vmul.f32 0.5, %v144_v5 }
  0x9c   :  { %v148_v7 = vmul.f32 %v147_v6, %v147_v6 }
  0x9e   :  { %v149_v8 = vmin.f32 %v148_v7, 16.0 }
  0xa0   :  { %v150_v9 = vmul.f32 2.1237322e-06, %v149_v8  ;;  %v161_v10 = vmul.f32 3.8918573e-05, %v149_v8 }
  0xa2   :  { %v151_v11 = vadd.f32 0.00028619796, %v150_v9  ;;  %v162_v12 = vadd.f32 0.001143296, %v161_v10 }
  0xa4   :  { %v152_v13 = vmul.f32 %v151_v11, %v149_v8  ;;  %v163_v14 = vmul.f32 %v162_v12, %v149_v8 }
  0xa6   :  { %v164_v15 = vadd.f32 0.014752088, %v163_v14  ;;  %v153_v16 = vadd.f32 0.0036580483, %v152_v13  ;;  %v489_v13 = vld [vmem:[%s772_s3] ss:$0 sm:$0xff] }
  0xa8   :  { %v165_v17 = vmul.f32 %v164_v15, %v149_v8  ;;  %v154_v19 = vmul.f32 %v153_v16, %v149_v8  ;;  %v490_v16 = vld [vmem:[%s773_s4] ss:$0 sm:$0xff] }
  0xaa   :  { %v166_v18 = vadd.f32 0.112945676, %v165_v17  ;;  %v155_v22 = vadd.f32 0.05243302, %v154_v19  ;;  %v325_v19 = vld [vmem:[#allocation8 + $0x78] sm:$0xff] }
  0xab   :  { %330 = vmatpush.msra.mxu2 %v325_v19  ;;  %v405_v19 = vld [vmem:[#allocation10 + $0x58] sm:$0xff] }
  0xac   :  { %v167_v20 = vmul.f32 %v166_v18, %v149_v8  ;;  %v156_v25 = vmul.f32 %v155_v22, %v149_v8  ;;  %v491_v22 = vld [vmem:[%s775_s6] ss:$0 sm:$0xff] }
  0xae   :  { %v168_v21 = vadd.f32 0.4994258, %v167_v20  ;;  %v157_v26 = vadd.f32 0.18741608, %v156_v25  ;;  %v324_v20 = vld [vmem:[#allocation8 + $0x70] sm:$0xff] }
  0xaf   :  { %331 = vmatpush.msra.mxu2 %v324_v20  ;;  %v320_v25 = vld [vmem:[#allocation8 + $0x50] sm:$0xff] }
  0xb0   :  { %v169_v23 = vmul.f32 %v168_v21, %v149_v8  ;;  %v158_v28 = vmul.f32 %v157_v26, %v149_v8  ;;  %v323_v21 = vld [vmem:[#allocation8 + $0x68] sm:$0xff]  ;;  %v404_v20 = vld [vmem:[#allocation10 + $0x50] sm:$0xff] }
  0xb1   :  { %332 = vmatpush.msra.mxu2 %v323_v21 }
  0xb2   :  { %v170_v24 = vadd.f32 1.0, %v169_v23  ;;  %v159_v32 = vadd.f32 1.1283791, %v158_v28  ;;  %v322_v23 = vld [vmem:[#allocation8 + $0x60] sm:$0xff]  ;;  %v319_v28 = vld [vmem:[#allocation8 + $0x48] sm:$0xff] }
  0xb3   :  { %333 = vmatpush.msra.mxu2 %v322_v23  ;;  %v403_v23 = vld [vmem:[#allocation10 + $0x48] sm:$0xff] }
  0xb4   :  { %494 = vrcp.f32 %v170_v24  ;;  %v182_v31 = vand.u32 2147483648, %v170_v24  ;;  %v180_v34 = vand.u32 2147483647, %v170_v24  ;;  %vm176_vm2 = vweird.f32 %v170_v24 }
  0xb5   :  { %v160_v37 = vmul.f32 %v159_v32, %v147_v6  ;;  %v317_v32 = vld [vmem:[#allocation8 + $0x38] sm:$0xff] }
  0xb6   :  { %v183_v36 = vor.u32 1.1754944e-38, %v182_v31  ;;  %vm181_vm4 = vcmp.eq.f32.partialorder %v180_v34, 8.507059e+37  ;;  %v316_v34 = vld [vmem:[#allocation8 + $0x30] sm:$0xff] }
  0xba   :  { %v495_v27 = vpop.eup %494 }
  0xbb   :  { %v172_v29 = vmul.f32 %v495_v27, %v170_v24  ;;  %vm177_vm1 = vweird.f32 %v495_v27  ;;  %v321_v24 = vld [vmem:[#allocation8 + $0x58] sm:$0xff] }
  0xbc   :  { %vm178_vm3 = vmor %vm176_vm2, %vm177_vm1  ;;  %334 = vmatpush.msra.mxu2 %v321_v24 }
  0xbd   :  { %v173_v30 = vsub.f32 1.0, %v172_v29 }
  0xbe   :  { %335 = vmatpush.msra.mxu2 %v320_v25  ;;  %v402_v25 = vld [vmem:[#allocation10 + $0x40] sm:$0xff] }
  0xbf   :  { %v174_v33 = vmul.f32 %v495_v27, %v173_v30  ;;  %v318_v30 = vld [vmem:[#allocation8 + $0x40] sm:$0xff] }
  0xc0   :  { %336 = vmatpush.msra.mxu2 %v319_v28 }
  0xc1   :  { %v175_v35 = vadd.f32 %v495_v27, %v174_v33 }
  0xc2   :  { %337 = vmatpush.msra.mxu2 %v318_v30 }
  0xc3   :  { %v179_v38 = vsel %vm178_vm3, %v495_v27, %v175_v35  ;;  %vm452_vm3 = vcmp.ge.s32.totalorder %v746_v48, 8 }
  0xc4   :  { %v184_v39 = vsel %vm181_vm4, %v183_v36, %v179_v38  ;;  %338 = vmatpush.msra.mxu2 %v317_v32  ;;  %v315_v36 = vld [vmem:[#allocation8 + $0x28] sm:$0xff]  ;;  %vm453_vm4 = vcmp.lt.s32.totalorder %v746_v48, 16 }
  0xc5   :  { %v185_v40 = vmul.f32 %v184_v39, %v160_v37  ;;  %v314_v39 = vld [vmem:[#allocation8 + $0x20] sm:$0xff] }
  0xc6   :  { %339 = vmatpush.msra.mxu2 %v316_v34  ;;  %v398_v34 = vld [vmem:[#allocation10 + $0x20] sm:$0xff] }
  0xc7   :  { %v477_v41 = vclamps-f32 %v185_v40, 1.0 }
  0xc8   :  { %340 = vmatpush.msra.mxu2 %v315_v36 }
  0xc9   :  { %v188_v43 = vadd.f32 1.0, %v477_v41 }
  0xca   :  { %341 = vmatpush.msra.mxu2 %v314_v39  ;;  %v396_v39 = vld [vmem:[#allocation10 + $0x10] sm:$0xff] }
  0xcb   :  { %v189_v44 = vmul.f32 %v188_v43, %v146_v42  ;;  %v313_v42 = vld [vmem:[#allocation8 + $0x18] sm:$0xff] }
  0xcc   :  { %342 = vmatpush.msra.mxu2 %v313_v42  ;;  %v395_v42 = vld [vmem:[#allocation10 + $0x8] sm:$0xff] }
  0xcd   :  { %193 = vadd.xlane.f32.xlu0 %v189_v44 }
 0x140   :  { %v194_v49 = vpop.xlane.xlu0 %193 }
 0x141   :  { %v195_v50 = vmul.f32 0.03125, %v194_v49 }
 0x143   :  { %v196_v51 = vsub.f32 %v189_v44, %v195_v50  ;;  %v312_v44 = vld [vmem:[#allocation8 + $0x10] sm:$0xff]  ;;  %v310_v50 = vld [vmem:[#allocation8] sm:$0xff] }
 0x144   :  { %343 = vmatpush.msra.mxu2 %v312_v44  ;;  %v394_v44 = vld [vmem:[#allocation10] sm:$0xff] }
 0x145   :  { %v199_v52 = vsel %vm192_vm5, %v196_v51, 0.0  ;;  %vm454_vm5 = vmand %vm452_vm3, %vm453_vm4 }
 0x146   :  { %v200_v53 = vmul.f32 %v199_v52, %v199_v52  ;;  %344 = vmatpush.msra.mxu2 %v311_v47 }
 0x148   :  { %201 = vadd.xlane.f32.xlu0 %v200_v53  ;;  %345 = vmatpush.msra.mxu2 %v310_v50 }
 0x1bb   :  { %v202_v4 = vpop.xlane.xlu0 %201 }
 0x1bc   :  { %v203_v5 = vmul.f32 0.03125, %v202_v4 }
 0x1be   :  { %v204_v6 = vadd.f32 1e-05, %v203_v5 }
 0x1c0   :  { %496 = vrsqrt.f32 %v204_v6  ;;  %vm211_vm7 = vweird.f32 %v204_v6 }
 0x1c6   :  { %v497_v7 = vpop.eup %496 }
 0x1c7   :  { %v206_v8 = vmul.f32 %v497_v7, %v204_v6  ;;  %vm212_vm6 = vweird.f32 %v497_v7 }
 0x1c8   :  { %vm213_vm8 = vmor %vm211_vm7, %vm212_vm6 }
 0x1c9   :  { %v207_v9 = vmul.f32 %v497_v7, %v206_v8 }
 0x1cb   :  { %v208_v10 = vmul.f32 0.5, %v207_v9 }
 0x1cd   :  { %v209_v11 = vsub.f32 1.5, %v208_v10 }
 0x1cf   :  { %v210_v12 = vmul.f32 %v497_v7, %v209_v11 }
 0x1d1   :  { %v214_v14 = vsel %vm213_vm8, %v497_v7, %v210_v12 }
 0x1d2   :  { %v215_v15 = vmul.f32 %v214_v14, %v199_v52  ;;  %v409_v14 = vld [vmem:[#allocation10 + $0x78] sm:$0xff] }
 0x1d3   :  { %414 = vmatpush.msra.mxu3 %v409_v14 }
 0x1d4   :  { %v220_v17 = vmul.f32 %v489_v13, %v215_v15  ;;  %v408_v15 = vld [vmem:[#allocation10 + $0x70] sm:$0xff] }
 0x1d5   :  { %415 = vmatpush.msra.mxu3 %v408_v15 }
 0x1d6   :  { %v225_v18 = vadd.f32 %v490_v16, %v220_v17  ;;  %v407_v16 = vld [vmem:[#allocation10 + $0x68] sm:$0xff] }
 0x1d7   :  { %416 = vmatpush.msra.mxu3 %v407_v16  ;;  %v492_v17 = vld [vmem:[%s777_s8] ss:$0 sm:$0xff] }
 0x1d8   :  { %262 = vmatmul.f32.vlgmr.msra.gmra.mxu1 %v225_v18  ;;  %v406_v18 = vld [vmem:[#allocation10 + $0x60] sm:$0xff] }
 0x1d9   :  { %417 = vmatpush.msra.mxu3 %v406_v18 }
 0x1db   :  { %418 = vmatpush.msra.mxu3 %v405_v19 }
 0x1dd   :  { %419 = vmatpush.msra.mxu3 %v404_v20 }
 0x1df   :  { %420 = vmatpush.msra.mxu3 %v403_v23 }
 0x1e1   :  { %421 = vmatpush.msra.mxu3 %v402_v25 }
 0x255   :  { %v263_v26 = vpop.f32.mrf.mxu1 }
 0x256   :  { %v264_v27 = vadd.f32 %v491_v22, %v263_v26 }
 0x258   :  { %v267_v29 = vmul.f32 0.70710677, %v264_v27  ;;  %v266_v11 = vmul.f32 0.5, %v264_v27  ;;  %v401_v27 = vld [vmem:[#allocation10 + $0x38] sm:$0xff] }
 0x259   :  { %422 = vmatpush.msra.mxu3 %v401_v27 }
 0x25a   :  { %v268_v31 = vmul.f32 %v267_v29, %v267_v29 }
 0x25c   :  { %v269_v33 = vmin.f32 %v268_v31, 16.0  ;;  %v399_v31 = vld [vmem:[#allocation10 + $0x28] sm:$0xff] }
 0x25e   :  { %v270_v35 = vmul.f32 2.1237322e-06, %v269_v33  ;;  %v281_v37 = vmul.f32 3.8918573e-05, %v269_v33 }
 0x260   :  { %v271_v38 = vadd.f32 0.00028619796, %v270_v35  ;;  %v282_v40 = vadd.f32 0.001143296, %v281_v37  ;;  %v397_v37 = vld [vmem:[#allocation10 + $0x18] sm:$0xff] }
 0x262   :  { %v272_v41 = vmul.f32 %v271_v38, %v269_v33  ;;  %v283_v43 = vmul.f32 %v282_v40, %v269_v33 }
 0x264   :  { %v284_v45 = vadd.f32 0.014752088, %v283_v43  ;;  %v273_v46 = vadd.f32 0.0036580483, %v272_v41 }
 0x266   :  { %v285_v49 = vmul.f32 %v284_v45, %v269_v33  ;;  %v274_v52 = vmul.f32 %v273_v46, %v269_v33 }
 0x268   :  { %v286_v51 = vadd.f32 0.112945676, %v285_v49  ;;  %v275_v55 = vadd.f32 0.05243302, %v274_v52 }
 0x26a   :  { %v287_v53 = vmul.f32 %v286_v51, %v269_v33  ;;  %v276_v58 = vmul.f32 %v275_v55, %v269_v33 }
 0x26c   :  { %v288_v54 = vadd.f32 0.4994258, %v287_v53  ;;  %v277_v59 = vadd.f32 0.18741608, %v276_v58 }
 0x26e   :  { %v289_v56 = vmul.f32 %v288_v54, %v269_v33  ;;  %v278_v61 = vmul.f32 %v277_v59, %v269_v33 }
 0x270   :  { %v290_v57 = vadd.f32 1.0, %v289_v56  ;;  %v279_v1 = vadd.f32 1.1283791, %v278_v61 }
 0x272   :  { %498 = vrcp.f32 %v290_v57  ;;  %v302_v0 = vand.u32 2147483648, %v290_v57  ;;  %v300_v3 = vand.u32 2147483647, %v290_v57  ;;  %vm296_vm10 = vweird.f32 %v290_v57 }
 0x273   :  { %v280_v6 = vmul.f32 %v279_v1, %v267_v29  ;;  %v400_v29 = vld [vmem:[#allocation10 + $0x30] sm:$0xff] }
 0x274   :  { %v303_v5 = vor.u32 1.1754944e-38, %v302_v0  ;;  %vm301_vm12 = vcmp.eq.f32.partialorder %v300_v3, 8.507059e+37  ;;  %423 = vmatpush.msra.mxu3 %v400_v29 }
 0x276   :  { %424 = vmatpush.msra.mxu3 %v399_v31 }
 0x278   :  { %v499_v60 = vpop.eup %498  ;;  %425 = vmatpush.msra.mxu3 %v398_v34 }
 0x279   :  { %v292_v62 = vmul.f32 %v499_v60, %v290_v57  ;;  %vm297_vm9 = vweird.f32 %v499_v60 }
 0x27a   :  { %vm298_vm11 = vmor %vm296_vm10, %vm297_vm9  ;;  %426 = vmatpush.msra.mxu3 %v397_v37 }
 0x27b   :  { %v293_v63 = vsub.f32 1.0, %v292_v62 }
 0x27c   :  { %427 = vmatpush.msra.mxu3 %v396_v39 }
 0x27d   :  { %v294_v2 = vmul.f32 %v499_v60, %v293_v63 }
 0x27e   :  { %428 = vmatpush.msra.mxu3 %v395_v42 }
 0x27f   :  { %v295_v4 = vadd.f32 %v499_v60, %v294_v2 }
 0x280   :  { %429 = vmatpush.msra.mxu3 %v394_v44 }
 0x281   :  { %v299_v7 = vsel %vm298_vm11, %v499_v60, %v295_v4 }
 0x282   :  { %v304_v8 = vsel %vm301_vm12, %v303_v5, %v299_v7 }
 0x283   :  { %v305_v9 = vmul.f32 %v304_v8, %v280_v6 }
 0x285   :  { %v478_v10 = vclamps-f32 %v305_v9, 1.0  ;;  %v493_v9 = vld [vmem:[%s779_s10] ss:$0 sm:$0xff]  ;;  %s667_s10 = smov [#allocation11]  }
 0x286   :  { %s462_s27 = sshll.u32 %s667_s10, 4  ;;  %s463_s27 = int_to_ptr.vmem [resolvable:$true] %s462_s27 }
 0x287   :  { %v308_v12 = vadd.f32 1.0, %v478_v10 }
 0x289   :  { %v309_v13 = vmul.f32 %v308_v12, %v266_v11 }
 0x28b   :  { %346 = vmatmul.f32.vlgmr.msra.gmra.mxu2 %v309_v13 }
 0x30e   :  { %v347_v21 = vpop.f32.mrf.mxu2 }
 0x30f   :  { %v348_v22 = vadd.f32 %v492_v17, %v347_v21 }
 0x311   :  { %v351_v24 = vmul.f32 0.70710677, %v348_v22  ;;  %v350_v6 = vmul.f32 0.5, %v348_v22 }
 0x313   :  { %v352_v26 = vmul.f32 %v351_v24, %v351_v24 }
 0x315   :  { %v353_v28 = vmin.f32 %v352_v26, 16.0 }
 0x317   :  { %v354_v30 = vmul.f32 2.1237322e-06, %v353_v28  ;;  %v365_v32 = vmul.f32 3.8918573e-05, %v353_v28 }
 0x319   :  { %v355_v33 = vadd.f32 0.00028619796, %v354_v30  ;;  %v366_v35 = vadd.f32 0.001143296, %v365_v32 }
 0x31b   :  { %v356_v36 = vmul.f32 %v355_v33, %v353_v28  ;;  %v367_v38 = vmul.f32 %v366_v35, %v353_v28 }
 0x31d   :  { %v368_v40 = vadd.f32 0.014752088, %v367_v38  ;;  %v357_v41 = vadd.f32 0.0036580483, %v356_v36 }
 0x31f   :  { %v369_v43 = vmul.f32 %v368_v40, %v353_v28  ;;  %v358_v46 = vmul.f32 %v357_v41, %v353_v28 }
 0x321   :  { %v370_v45 = vadd.f32 0.112945676, %v369_v43  ;;  %v359_v50 = vadd.f32 0.05243302, %v358_v46 }
 0x323   :  { %v371_v47 = vmul.f32 %v370_v45, %v353_v28  ;;  %v360_v53 = vmul.f32 %v359_v50, %v353_v28 }
 0x325   :  { %v372_v49 = vadd.f32 0.4994258, %v371_v47  ;;  %v361_v54 = vadd.f32 0.18741608, %v360_v53 }
 0x327   :  { %v373_v51 = vmul.f32 %v372_v49, %v353_v28  ;;  %v362_v56 = vmul.f32 %v361_v54, %v353_v28 }
 0x329   :  { %v374_v52 = vadd.f32 1.0, %v373_v51  ;;  %v363_v60 = vadd.f32 1.1283791, %v362_v56 }
 0x32b   :  { %500 = vrcp.f32 %v374_v52  ;;  %v386_v59 = vand.u32 2147483648, %v374_v52  ;;  %v384_v62 = vand.u32 2147483647, %v374_v52  ;;  %vm380_vm14 = vweird.f32 %v374_v52 }
 0x32c   :  { %v364_v1 = vmul.f32 %v363_v60, %v351_v24 }
 0x32d   :  { %v387_v0 = vor.u32 1.1754944e-38, %v386_v59  ;;  %vm385_vm0 = vcmp.eq.f32.partialorder %v384_v62, 8.507059e+37 }
 0x331   :  { %v501_v55 = vpop.eup %500 }
 0x332   :  { %v376_v57 = vmul.f32 %v501_v55, %v374_v52  ;;  %vm381_vm13 = vweird.f32 %v501_v55 }
 0x333   :  { %vm382_vm15 = vmor %vm380_vm14, %vm381_vm13 }
 0x334   :  { %v377_v58 = vsub.f32 1.0, %v376_v57 }
 0x336   :  { %v378_v61 = vmul.f32 %v501_v55, %v377_v58 }
 0x338   :  { %v379_v63 = vadd.f32 %v501_v55, %v378_v61 }
 0x33a   :  { %v383_v2 = vsel %vm382_vm15, %v501_v55, %v379_v63 }
 0x33b   :  { %v388_v3 = vsel %vm385_vm0, %v387_v0, %v383_v2 }
 0x33c   :  { %v389_v4 = vmul.f32 %v388_v3, %v364_v1 }
 0x33e   :  { %v479_v5 = vclamps-f32 %v389_v4, 1.0 }
 0x340   :  { %v392_v7 = vadd.f32 1.0, %v479_v5 }
 0x342   :  { %v393_v8 = vmul.f32 %v392_v7, %v350_v6 }
 0x344   :  { %430 = vmatmul.f32.vlgmr.msra.gmra.mxu3 %v393_v8 }
 0x3c7   :  { %v431_v10 = vpop.f32.mrf.mxu3 }
 0x3c8   :  { %v432_v11 = vadd.f32 %v493_v9, %v431_v10 }
 0x3ca   :  { %v435_v12 = vmin.f32 %v432_v11, 20.0  ;;  %vm434_vm2 = vcmp.gt.f32.partialorder %v432_v11, 20.0 }
 0x3cc   :  { %v436_v13 = vmul.f32 1.442695, %v435_v12 }
 0x3ce   :  { %502 = vpow2.f32 %v436_v13 }
 0x3d4   :  { %v503_v14 = vpop.eup %502 }
 0x3d5   :  { %v438_v15 = vadd.f32 1.0, %v503_v14  ;;  %v441_v16 = vmul.f32 -0.5, %v503_v14  ;;  %v444_v18 = vand.u32 2147483647, %v503_v14 }
 0x3d7   :  { %504 = vlog2.f32 %v438_v15  ;;  %v442_v17 = vadd.f32 1.0, %v441_v16  ;;  %vm445_vm1 = vcmp.lt.f32.partialorder %v444_v18, 0.0004427343 }
 0x3d9   :  { %v443_v21 = vmul.f32 %v503_v14, %v442_v17 }
 0x3dd   :  { %v505_v19 = vpop.eup %504 }
 0x3de   :  { %v440_v20 = vmul.f32 0.6931472, %v505_v19 }
 0x3e0   :  { %v446_v22 = vsel %vm445_vm1, %v443_v21, %v440_v20 }
 0x3e1   :  { %v447_v23 = vsel %vm434_vm2, %v432_v11, %v446_v22 }
 0x3e2   :  { %v448_v24 = vmax.f32 %v447_v23, 0.0001 }
 0x3e4   :  { %v449_v25 = vmin.f32 %v448_v24, 5.0 }
 0x3e6   :  { %506 = vlog2.f32 %v449_v25 }
 0x3ec   :  { %v507_v26 = vpop.eup %506 }
 0x3ed   :  { %v451_v27 = vmul.f32 0.6931472, %v507_v26 }
 0x3ef   :  { %v455_v28 = vsel %vm454_vm5, %v451_v27, %v432_v11 }
 0x3f0   :  { %456 = vst [vmem:[#allocation11] sm:$0xff] %v455_v28 }
 0x3f1   :  { %467 = dma.vmem_to_hbm [thread:$0]  %s463_s27, 128, %s465_s30, [#allocation4]  }
 0x3f2   :  { %658 = dma.done.wait [#allocation4], 128  }
 0x3f3   :  { %659 = vsyncadd [#allocation4], 4294967168 }
 0x3f4   :  { %472 = vsyncpa [#allocation3], 1 }
 0x3f5   :  { %473 = vsyncpa [#allocation6], 1 }
 0x3f6   :  { %474 = vsyncpa [#allocation9], 1 }
 0x3f7   :  { %475 = vsyncpa [#allocation4], 1 }

</bundles_post_ra>
